<compile_context>
chip_gen: v6e
topology: v6e:2x2x1
jax: 0.10.0
libtpu: 0.0.40
codegen_flags: <defaults>
</compile_context>

<pallas_src>
import functools
import math

import jax
import jax.numpy as jnp
from jax.experimental import pallas as pl
from jax.experimental.pallas import tpu as pltpu

_LANES = 128
_TARGET_BLOCK_BYTES = 6 * 1024 * 1024   # ~6 MiB per block (see header)
_VMEM_LIMIT_BYTES = 48 << 20            # fits 4 x 6 MiB buffers + scratch everywhere


def _denorm_kernel(x_ref, o_ref, *, scale, offset):
    # scale/offset are weak-typed Python floats -> arithmetic stays in x's
    # dtype (bf16 stays bf16, f32 stays f32).
    o_ref[...] = x_ref[...] * scale + offset


def denormalize(x, output_min, output_max, *, donate_input=False):
    """Applies x * (output_max - output_min) + output_min elementwise."""
    scale = float(output_max) - float(output_min)
    offset = float(output_min)

    orig_shape = x.shape
    n = math.prod(orig_shape) if orig_shape else 1
    dtype = jnp.dtype(x.dtype)
    itemsize = dtype.itemsize

    # Fallback paths: empty arrays, element counts that don't factor into a
    # lane-dense (rows, 128) slab, and non-floating dtypes (a Python-float
    # scale would promote x and then truncate into an int-typed output ref).
    # One fused XLA mul-add is a single HBM pass -- cheaper than any
    # pad->kernel->slice route.
    if (
        n == 0
        or n % _LANES != 0
        or not jnp.issubdtype(dtype, jnp.floating)
    ):
        return x * scale + offset

    slab = x.reshape(-1, _LANES)     # free reshape, no copy
    rows = slab.shape[0]

    # Per-dtype sublane packing granule: 8 rows (f32), 16 (bf16), 32 (int8/fp8).
    pack = max(8, 32 // itemsize)

    tile_rows = _TARGET_BLOCK_BYTES // (_LANES * itemsize)
    tile_rows = max(pack, (tile_rows // pack) * pack)
    tile_rows = min(tile_rows, rows)  # full extent for small inputs

    grid = (pl.cdiv(rows, tile_rows),)

    kernel = functools.partial(_denorm_kernel, scale=scale, offset=offset)

    out_slab = pl.pallas_call(
        kernel,
        out_shape=jax.ShapeDtypeStruct((rows, _LANES), slab.dtype),
        grid=grid,
        in_specs=[pl.BlockSpec((tile_rows, _LANES), lambda i: (i, 0))],
        # TODO(synk): sweep pipeline_mode=pl.Buffered(3) on the input spec on
        # v7x (fast HBM makes the per-step issue bubble the dominant cost).
        out_specs=pl.BlockSpec((tile_rows, _LANES), lambda i: (i, 0)),
        compiler_params=pltpu.CompilerParams(
            dimension_semantics=("parallel",),
            vmem_limit_bytes=_VMEM_LIMIT_BYTES,
        ),
        cost_estimate=pl.CostEstimate(
            flops=2 * n,
            bytes_accessed=2 * n * itemsize,
            transcendentals=0,
        ),
        # Only alias when the caller actually donates x (otherwise XLA inserts
        # a defensive copy, adding an extra HBM pass).
        input_output_aliases=({0: 0} if donate_input else {}),
    )(slab)

    return out_slab.reshape(orig_shape)


if __name__ == "__main__":
    # Deterministic "parameters" of the module (scalars from __init__).
    output_min = -2.5
    output_max = 7.5

    key = jax.random.PRNGKey(0)

    # Main case: NCHW activation, element count a multiple of 128 -> kernel path.
    x = jax.random.uniform(key, (2, 4, 16, 16), dtype=jnp.float32)
    y = jax.block_until_ready(denormalize(x, output_min, output_max))
    y_ref = x * (output_max - output_min) + output_min
    assert y.shape == x.shape and y.dtype == x.dtype
    assert jnp.allclose(y, y_ref, atol=1e-6), "mismatch vs reference (kernel path)"

    # Ragged case (n % 128 != 0) exercises the plain-XLA fallback.
    x2 = jax.random.uniform(jax.random.PRNGKey(0), (3, 5, 7), dtype=jnp.float32)
    y2 = jax.block_until_ready(denormalize(x2, output_min, output_max))
    y2_ref = x2 * (output_max - output_min) + output_min
    assert y2.shape == x2.shape and y2.dtype == x2.dtype
    assert jnp.allclose(y2, y2_ref, atol=1e-6), "mismatch vs reference (fallback path)"

    print("KERNEL_OK")
</pallas_src>

<mosaic_0001>
module attributes {stable_mosaic.version = 11 : i64} {
  func.func @_denorm_kernel(%arg0: i32, %arg1: memref<16x128xf32, #tpu.memory_space<vmem>>, %arg2: memref<16x128xf32, #tpu.memory_space<vmem>>) attributes {dimension_semantics = [#tpu.dimension_semantics<parallel>], iteration_bounds = array<i64: 1>, scalar_prefetch = 0 : i64, scratch_operands = 0 : i64, tpu.core_type = #tpu.core_type<tc>, window_params = [{transform_indices = @transform_0, window_bounds = array<i64: 16, 128>}, {transform_indices = @transform_1, window_bounds = array<i64: 16, 128>}]} {
    %c0 = arith.constant 0 : index
    %c0_0 = arith.constant 0 : index
    %0 = vector.load %arg1[%c0, %c0_0] : memref<16x128xf32, #tpu.memory_space<vmem>>, vector<16x128xf32>
    %cst = arith.constant 1.000000e+01 : f32
    %1 = vector.broadcast %cst : f32 to vector<16x128xf32>
    %2 = arith.mulf %0, %1 : vector<16x128xf32>
    %cst_1 = arith.constant -2.500000e+00 : f32
    %3 = vector.broadcast %cst_1 : f32 to vector<16x128xf32>
    %4 = arith.addf %2, %3 : vector<16x128xf32>
    %c0_2 = arith.constant 0 : index
    %c0_3 = arith.constant 0 : index
    %5 = vector.load %arg2[%c0_2, %c0_3] : memref<16x128xf32, #tpu.memory_space<vmem>>, vector<16x128xf32>
    tpu.vector_store %arg2[%c0_2, %c0_3], %4 {strides = array<i32>} : memref<16x128xf32, #tpu.memory_space<vmem>>, vector<16x128xf32>,
    return
  }
  func.func @transform_0(%arg0: i32) -> (i32, i32) {
    %c0_i32 = arith.constant 0 : i32
    %c0_i32_0 = arith.constant 0 : i32
    return %arg0, %c0_i32 : i32, i32
  }
  func.func @transform_1(%arg0: i32) -> (i32, i32) {
    %c0_i32 = arith.constant 0 : i32
    %c0_i32_0 = arith.constant 0 : i32
    return %arg0, %c0_i32 : i32, i32
  }
}

</mosaic_0001>

<bundles_post_ra>
// kernel: tpu_custom_call.1
= control target key start
LH: loop header
LB: loop body
LE: loop exit
PB: predicated region body
PF: predicated region fallthrough
CT: control target
= control target key end

     0   :  { %6 = vsyncpa [#allocation3], 0  ;;  %s116_s0 = inlined_call_operand.hbm [shape: f32[16,128], index: 0, kind: input, shape index: {}]   ;;  %s117_s1 = inlined_call_operand.hbm [shape: f32[16,128], index: 1, kind: output, shape index: {}]  }
   0x1   :  { %7 = vsyncpa [#allocation4], 0  ;;  %s96_s6 = smov [#allocation2]  }
   0x2   :  { %s13_s7 = sshll.u32 %s96_s6, 4  ;;  %s14_s7 = int_to_ptr.vmem [resolvable:$true] %s13_s7 }
   0x3   :  { %s60_s8 = scalar_lea.vmem %s14_s7, 256  ;;  %p65_p1 = scmp.lt.s32.totalorder %s14_s7, %s14_s7 }
   0x4   :  { %p61_p0 = scmp.ne.s32.totalorder %s14_s7, %s60_s8  ;;  %p66_p2 = scmp.lt.s32.totalorder %s60_s8, %s60_s8 }
   0x6   :  { %p67_p3 = por %p66_p2, %p65_p1 }
   0x8   :  { %p68_p4 = pnand %p67_p3, %p61_p0 }
   0xa   :  { %71 = shalt.err (!%p68_p4)
}
   0xb   :  { %s97_s9 = smov 128   ;;  %s98_s10 = smov 8  }
   0xc   :  { %19 = dma.hbm_to_vmem [thread:$0]  %s116_s0, 256, %s14_s7, [#allocation3], %s97_s9, %s97_s9, %s98_s10  }
   0xd   :  { %92 = dma.done.wait [#allocation3], 256  }
   0xe   :  { %93 = vsyncadd [#allocation3], 4294967040  ;;  %v23_v0 = vld [vmem:[#allocation2] sm:$0xff]  ;;  %v24_v1 = vld [vmem:[#allocation2 + $0x8] sm:$0xff]  ;;  %s99_s13 = smov [#allocation5]  }
   0xf   :  { %s36_s14 = sshll.u32 %s99_s13, 4  ;;  %v25_v2 = vmul.f32 10.0, %v23_v0  ;;  %v26_v3 = vmul.f32 10.0, %v24_v1  ;;  %s37_s14 = int_to_ptr.vmem [resolvable:$true] %s36_s14 }
  0x10   :  { %s72_s15 = scalar_lea.vmem %s37_s14, 256  ;;  %p77_p6 = scmp.lt.s32.totalorder %s37_s14, %s37_s14 }
  0x11   :  { %v27_v4 = vadd.f32 -2.5, %v25_v2  ;;  %v28_v5 = vadd.f32 -2.5, %v26_v3  ;;  %p73_p5 = scmp.ne.s32.totalorder %s37_s14, %s72_s15  ;;  %p78_p7 = scmp.lt.s32.totalorder %s72_s15, %s72_s15 }
  0x13   :  { %29 = vst [vmem:[#allocation5] sm:$0xff] %v27_v4  ;;  %30 = vst [vmem:[#allocation5 + $0x8] sm:$0xff] %v28_v5  ;;  %p79_p8 = por %p78_p7, %p77_p6 }
  0x15   :  { %p80_p9 = pnand %p79_p8, %p73_p5 }
  0x17   :  { %83 = shalt.err (!%p80_p9)
}
  0x18   :  { %42 = dma.vmem_to_hbm [thread:$0]  %s37_s14, 256, %s117_s1, [#allocation4], %s97_s9, %s97_s9, %s98_s10  }
  0x19   :  { %94 = dma.done.wait [#allocation4], 256  }
  0x1a   :  { %95 = vsyncadd [#allocation4], 4294967040 }
  0x1b   :  { %46 = vsyncpa [#allocation3], 1 }
  0x1c   :  { %47 = vsyncpa [#allocation4], 1 }

</bundles_post_ra>
